<compile_context>
chip_gen: v5e
topology: v5e:2x2
jax: 0.10.0
libtpu: 0.0.40
codegen_flags: <defaults>
</compile_context>

<pallas_src>
import functools
import math

import jax
import jax.numpy as jnp
from jax.experimental import pallas as pl
from jax.experimental.pallas import tpu as pltpu

EMBED_DIM = 60
DENSE_DIM = 64
NUM_HEADS = 4
HEAD_DIM = EMBED_DIM // NUM_HEADS    # 15
HEAD_PAD = 16                        # each head padded to 16 lanes (last lane zero)
QKV_PAD = NUM_HEADS * HEAD_PAD       # 64: q/k/v sections each 64 lanes wide
LN_EPS = 1e-5
NEG_INF = -1e30


def _layernorm(x, gamma, beta):
    # PyTorch LayerNorm: biased variance over the last dim, eps inside the sqrt.
    mean = jnp.mean(x, axis=-1, keepdims=True)
    var = jnp.mean((x - mean) ** 2, axis=-1, keepdims=True)
    return (x - mean) * jax.lax.rsqrt(var + LN_EPS) * gamma + beta


def transformer_encoder_kernel(
    x_ref,                  # (T, E)           f32, T = L*N tokens, row t = l*N + n
    wqkv_ref,               # (E, 3*QKV_PAD)   bf16  (head-padded in_proj weight, x@W form)
    bqkv_ref,               # (1, 3*QKV_PAD)   f32   (head-padded in_proj bias)
    wo_ref,                 # (QKV_PAD, E)     bf16  (out_proj.weight.T with zero pad rows)
    bo_ref,                 # (1, E)           f32
    ln1_g_ref, ln1_b_ref,   # (1, E)           f32
    w1_ref,                 # (E, D)           bf16  (dense1.weight.T)
    b1_ref,                 # (1, D)           f32
    w2_ref,                 # (D, E)           bf16  (dense2.weight.T)
    b2_ref,                 # (1, E)           f32
    ln2_g_ref, ln2_b_ref,   # (1, E)           f32
    out_ref,                # (T, E)           f32
    *, n_batch,
):
    x = x_ref[...]                                   # (T, E) f32
    T = x.shape[0]
    xb = x.astype(jnp.bfloat16)

    # ---- fused QKV projection: one MXU matmul -------------------------------------
    # 1/sqrt(HEAD_DIM) is pre-folded into the q columns / q bias.
    qkv = jnp.dot(xb, wqkv_ref[...], preferred_element_type=jnp.float32)
    qkv = qkv + bqkv_ref[...]                        # (T, 3*QKV_PAD) f32

    # tokens t, u attend to each other iff they are in the same batch: t % N == u % N
    tok = jax.lax.broadcasted_iota(jnp.int32, (T, T), 0)
    key = jax.lax.broadcasted_iota(jnp.int32, (T, T), 1)
    same_batch = (tok % n_batch) == (key % n_batch)

    # ---- per-head attention (static unroll, H=4), block-masked softmax ------------
    # All slices start at multiples of 16 lanes; pad lane of q/k is zero so scores
    # are unaffected, pad lane of v is zero so head output pad lane stays zero.
    head_outs = []
    for h in range(NUM_HEADS):
        q_h = qkv[:, h * HEAD_PAD:(h + 1) * HEAD_PAD]
        k_h = qkv[:, QKV_PAD + h * HEAD_PAD:QKV_PAD + (h + 1) * HEAD_PAD]
        v_h = qkv[:, 2 * QKV_PAD + h * HEAD_PAD:2 * QKV_PAD + (h + 1) * HEAD_PAD]

        s = jnp.einsum('td,ud->tu',
                       q_h.astype(jnp.bfloat16), k_h.astype(jnp.bfloat16),
                       preferred_element_type=jnp.float32)            # (T, T)
        s = jnp.where(same_batch, s, NEG_INF)
        s = s - jnp.max(s, axis=-1, keepdims=True)
        p = jnp.exp(s)
        p = p * pl.reciprocal(jnp.sum(p, axis=-1, keepdims=True), approx=True)
        head_outs.append(
            jnp.dot(p.astype(jnp.bfloat16), v_h.astype(jnp.bfloat16),
                    preferred_element_type=jnp.float32))              # (T, HEAD_PAD)

    o_cat = jnp.concatenate(head_outs, axis=-1)      # (T, QKV_PAD) f32, zeros at pad lanes

    # ---- fused output projection: one MXU matmul (zero rows eat the pad lanes) -----
    attn = jnp.dot(o_cat.astype(jnp.bfloat16), wo_ref[...],
                   preferred_element_type=jnp.float32) + bo_ref[...]

    # dropout1: identity (inference)
    out1 = _layernorm(x + attn, ln1_g_ref[...], ln1_b_ref[...])

    # ---- feed-forward: Linear(E->D) then Linear(D->E); no activation (per module) --
    h1 = jnp.dot(out1.astype(jnp.bfloat16), w1_ref[...],
                 preferred_element_type=jnp.float32) + b1_ref[...]
    h2 = jnp.dot(h1.astype(jnp.bfloat16), w2_ref[...],
                 preferred_element_type=jnp.float32) + b2_ref[...]

    # dropout2: identity (inference)
    out_ref[...] = _layernorm(out1 + h2, ln2_g_ref[...], ln2_b_ref[...])


def init_params(key):
    E, D, H, Dh, Hp = EMBED_DIM, DENSE_DIM, NUM_HEADS, HEAD_DIM, HEAD_PAD
    ks = jax.random.split(key, 8)
    s = 0.05
    in_proj_w = jax.random.normal(ks[0], (3 * E, E), jnp.float32) * s   # rows: [Wq; Wk; Wv]
    in_proj_b = jax.random.normal(ks[1], (3 * E,), jnp.float32) * s
    wo = jax.random.normal(ks[2], (E, E), jnp.float32) * s
    bo = jax.random.normal(ks[3], (E,), jnp.float32) * s
    w1 = jax.random.normal(ks[4], (D, E), jnp.float32) * s
    b1 = jax.random.normal(ks[5], (D,), jnp.float32) * s
    w2 = jax.random.normal(ks[6], (E, D), jnp.float32) * s
    b2 = jax.random.normal(ks[7], (E,), jnp.float32) * s

    scale = 1.0 / math.sqrt(Dh)     # folded into the q section (weight AND bias)
    sec_scale = (scale, 1.0, 1.0)

    # Head-padded fused QKV weight in x @ W form: head h of section sec occupies
    # columns [sec*64 + h*16, sec*64 + h*16 + 15); column sec*64 + h*16 + 15 is zero.
    wqkv = jnp.zeros((E, 3 * QKV_PAD), jnp.float32)
    bqkv = jnp.zeros((1, 3 * QKV_PAD), jnp.float32)
    for sec in range(3):
        for h in range(H):
            src_w = in_proj_w[sec * E + h * Dh: sec * E + (h + 1) * Dh]   # (Dh, E)
            src_b = in_proj_b[sec * E + h * Dh: sec * E + (h + 1) * Dh]   # (Dh,)
            dst = sec * QKV_PAD + h * Hp
            wqkv = wqkv.at[:, dst:dst + Dh].set(src_w.T * sec_scale[sec])
            bqkv = bqkv.at[0, dst:dst + Dh].set(src_b * sec_scale[sec])

    # Out-proj weight (x @ W.T form) with zero rows at the per-head pad positions:
    # padded row h*16 + d corresponds to unpadded concat-head dim h*15 + d.
    wo_t = wo.T                                      # (E_concat, E_out)
    wo_pad = jnp.zeros((H * Hp, E), jnp.float32)
    for h in range(H):
        wo_pad = wo_pad.at[h * Hp:h * Hp + Dh, :].set(wo_t[h * Dh:(h + 1) * Dh, :])

    return dict(
        # matmul weights pre-transposed / head-padded and cast to bf16 (MXU-native);
        # biases / LayerNorm params stay f32.
        wqkv=wqkv.astype(jnp.bfloat16), bqkv=bqkv,
        wo=wo_pad.astype(jnp.bfloat16), bo=bo.reshape(1, E),
        ln1_g=jnp.ones((1, E), jnp.float32), ln1_b=jnp.zeros((1, E), jnp.float32),
        w1=w1.T.astype(jnp.bfloat16), b1=b1.reshape(1, D),
        w2=w2.T.astype(jnp.bfloat16), b2=b2.reshape(1, E),
        ln2_g=jnp.ones((1, E), jnp.float32), ln2_b=jnp.zeros((1, E), jnp.float32),
    )


def transformer_encoder(x_lne, params):
    """x_lne: (L, N, E) float32 — PyTorch seq-first layout. Returns (L, N, E)."""
    L, N, E = x_lne.shape
    assert E == EMBED_DIM
    T = L * N
    D, H, Dh = DENSE_DIM, NUM_HEADS, HEAD_DIM
    # Free (bitcast) row-major reshape; row t = l*N + n, so batch id == t % N.
    # The in-kernel parity mask depends on exactly this layout.
    xf = x_lne.reshape(T, E)

    args = (
        xf,
        params['wqkv'], params['bqkv'],
        params['wo'], params['bo'],
        params['ln1_g'], params['ln1_b'],
        params['w1'], params['b1'],
        params['w2'], params['b2'],
        params['ln2_g'], params['ln2_b'],
    )

    flops = (2 * T * E * (3 * QKV_PAD)          # fused QKV proj
             + 2 * H * T * T * HEAD_PAD * 2     # scores + p@v
             + 2 * T * QKV_PAD * E              # out proj
             + 2 * (2 * T * E * D))             # FFN
    transcendentals = H * T * T + H * T + 2 * T
    bytes_accessed = (2 * T * E * 4
                      + (E * 3 * QKV_PAD + QKV_PAD * E + 2 * E * D) * 2
                      + (3 * QKV_PAD + E + D + E + 4 * E) * 4)

    vmem = pl.BlockSpec(memory_space=pltpu.MemorySpace.VMEM)
    out = pl.pallas_call(
        functools.partial(transformer_encoder_kernel, n_batch=N),
        out_shape=jax.ShapeDtypeStruct((T, E), jnp.float32),
        in_specs=[vmem] * len(args),
        out_specs=vmem,
        cost_estimate=pl.CostEstimate(flops=int(flops),
                                      transcendentals=int(transcendentals),
                                      bytes_accessed=int(bytes_accessed)),
    )(*args)
    return out.reshape(L, N, E)


if __name__ == "__main__":
    key = jax.random.PRNGKey(0)
    k_x, k_p = jax.random.split(key)
    L, N = 8, 2                                  # seq=8, batch=2, embed=60
    x = jax.random.normal(k_x, (L, N, EMBED_DIM), jnp.float32)
    params = init_params(k_p)

    out = transformer_encoder(x, params)
    jax.block_until_ready(out)
    assert out.shape == (L, N, EMBED_DIM) and out.dtype == jnp.float32
    print("KERNEL_OK")
</pallas_src>

<mosaic_0001>
module attributes {stable_mosaic.version = 11 : i64} {
  func.func @transformer_encoder_kernel(%arg0: memref<16x60xf32, #tpu.memory_space<vmem>>, %arg1: memref<60x192xbf16, #tpu.memory_space<vmem>>, %arg2: memref<1x192xf32, #tpu.memory_space<vmem>>, %arg3: memref<64x60xbf16, #tpu.memory_space<vmem>>, %arg4: memref<1x60xf32, #tpu.memory_space<vmem>>, %arg5: memref<1x60xf32, #tpu.memory_space<vmem>>, %arg6: memref<1x60xf32, #tpu.memory_space<vmem>>, %arg7: memref<60x64xbf16, #tpu.memory_space<vmem>>, %arg8: memref<1x64xf32, #tpu.memory_space<vmem>>, %arg9: memref<64x60xbf16, #tpu.memory_space<vmem>>, %arg10: memref<1x60xf32, #tpu.memory_space<vmem>>, %arg11: memref<1x60xf32, #tpu.memory_space<vmem>>, %arg12: memref<1x60xf32, #tpu.memory_space<vmem>>, %arg13: memref<16x60xf32, #tpu.memory_space<vmem>>) attributes {dimension_semantics = [], scalar_prefetch = 0 : i64, scratch_operands = 0 : i64, tpu.core_type = #tpu.core_type<tc>} {
    %c0 = arith.constant 0 : index
    %c0_0 = arith.constant 0 : index
    %0 = vector.load %arg0[%c0, %c0_0] : memref<16x60xf32, #tpu.memory_space<vmem>>, vector<16x60xf32>
    %1 = arith.truncf %0 : vector<16x60xf32> to vector<16x60xbf16>
    %c0_1 = arith.constant 0 : index
    %c0_2 = arith.constant 0 : index
    %2 = vector.load %arg1[%c0_1, %c0_2] : memref<60x192xbf16, #tpu.memory_space<vmem>>, vector<60x192xbf16>
    %cst = arith.constant dense<0.000000e+00> : vector<16x192xf32>
    %3 = tpu.matmul %1, %2, %cst {dimension_numbers = #tpu.dot_dimension_numbers<[1], [0], [0], [1], [0, 0, 1, 1], [], []>} : vector<16x60xbf16>, vector<60x192xbf16>, vector<16x192xf32> -> vector<16x192xf32>
    %c0_3 = arith.constant 0 : index
    %c0_4 = arith.constant 0 : index
    %4 = vector.load %arg2[%c0_3, %c0_4] : memref<1x192xf32, #tpu.memory_space<vmem>>, vector<1x192xf32>
    %5 = vector.broadcast %4 : vector<1x192xf32> to vector<16x192xf32>
    %6 = arith.addf %3, %5 : vector<16x192xf32>
    %7 = tpu.iota {dimensions = array<i32: 0>} : vector<16x16xi32>
    %8 = tpu.iota {dimensions = array<i32: 1>} : vector<16x16xi32>
    %c2_i32 = arith.constant 2 : i32
    %c0_i32 = arith.constant 0 : i32
    %9 = arith.cmpi eq, %c2_i32, %c0_i32 : i32
    %c1_i32 = arith.constant 1 : i32
    %10 = arith.select %9, %c1_i32, %c2_i32 : i32
    %11 = vector.broadcast %10 : i32 to vector<16x16xi32>
    %12 = arith.remsi %7, %11 : vector<16x16xi32>
    %c0_i32_5 = arith.constant 0 : i32
    %13 = vector.broadcast %c0_i32_5 : i32 to vector<16x16xi32>
    %14 = arith.cmpi ne, %12, %13 : vector<16x16xi32>
    %c0_i32_6 = arith.constant 0 : i32
    %15 = vector.broadcast %c0_i32_6 : i32 to vector<16x16xi32>
    %16 = arith.cmpi slt, %12, %15 : vector<16x16xi32>
    %c0_i32_7 = arith.constant 0 : i32
    %17 = arith.cmpi slt, %10, %c0_i32_7 : i32
    %18 = vector.broadcast %17 : i1 to vector<16x16xi1>
    %19 = vector.broadcast %18 : vector<16x16xi1> to vector<16x16xi1>
    %20 = arith.xori %16, %19 : vector<16x16xi1>
    %21 = arith.andi %20, %14 : vector<16x16xi1>
    %22 = vector.broadcast %10 : i32 to vector<16x16xi32>
    %23 = arith.addi %12, %22 : vector<16x16xi32>
    %24 = arith.select %21, %23, %12 : vector<16x16xi1>, vector<16x16xi32>
    %c2_i32_8 = arith.constant 2 : i32
    %c0_i32_9 = arith.constant 0 : i32
    %25 = arith.cmpi eq, %c2_i32_8, %c0_i32_9 : i32
    %c1_i32_10 = arith.constant 1 : i32
    %26 = arith.select %25, %c1_i32_10, %c2_i32_8 : i32
    %27 = vector.broadcast %26 : i32 to vector<16x16xi32>
    %28 = arith.remsi %8, %27 : vector<16x16xi32>
    %c0_i32_11 = arith.constant 0 : i32
    %29 = vector.broadcast %c0_i32_11 : i32 to vector<16x16xi32>
    %30 = arith.cmpi ne, %28, %29 : vector<16x16xi32>
    %c0_i32_12 = arith.constant 0 : i32
    %31 = vector.broadcast %c0_i32_12 : i32 to vector<16x16xi32>
    %32 = arith.cmpi slt, %28, %31 : vector<16x16xi32>
    %c0_i32_13 = arith.constant 0 : i32
    %33 = arith.cmpi slt, %26, %c0_i32_13 : i32
    %34 = vector.broadcast %33 : i1 to vector<16x16xi1>
    %35 = vector.broadcast %34 : vector<16x16xi1> to vector<16x16xi1>
    %36 = arith.xori %32, %35 : vector<16x16xi1>
    %37 = arith.andi %36, %30 : vector<16x16xi1>
    %38 = vector.broadcast %26 : i32 to vector<16x16xi32>
    %39 = arith.addi %28, %38 : vector<16x16xi32>
    %40 = arith.select %37, %39, %28 : vector<16x16xi1>, vector<16x16xi32>
    %41 = arith.cmpi eq, %24, %40 : vector<16x16xi32>
    %42 = vector.extract_strided_slice %6 {offsets = [0, 0], sizes = [16, 16], strides = [1, 1]} : vector<16x192xf32> to vector<16x16xf32>
    %43 = vector.extract_strided_slice %6 {offsets = [0, 64], sizes = [16, 16], strides = [1, 1]} : vector<16x192xf32> to vector<16x16xf32>
    %44 = vector.extract_strided_slice %6 {offsets = [0, 128], sizes = [16, 16], strides = [1, 1]} : vector<16x192xf32> to vector<16x16xf32>
    %45 = arith.truncf %42 : vector<16x16xf32> to vector<16x16xbf16>
    %46 = arith.truncf %43 : vector<16x16xf32> to vector<16x16xbf16>
    "tpu.trace_start"() <{level = 10 : i32, message = "td,ud->tu"}> : () -> ()
    %cst_14 = arith.constant dense<0.000000e+00> : vector<16x16xf32>
    %47 = tpu.matmul %45, %46, %cst_14 {dimension_numbers = #tpu.dot_dimension_numbers<[1], [1], [0], [0], [0, 0, 1, 0], [], []>} : vector<16x16xbf16>, vector<16x16xbf16>, vector<16x16xf32> -> vector<16x16xf32>
    %cst_15 = arith.constant -1.000000e+30 : f32
    "tpu.trace_stop"() : () -> ()
    %48 = vector.broadcast %cst_15 : f32 to vector<16x16xf32>
    %49 = arith.select %41, %47, %48 : vector<16x16xi1>, vector<16x16xf32>
    %cst_16 = arith.constant dense<0xFF800000> : vector<16xf32>
    %50 = vector.multi_reduction <maximumf>, %49, %cst_16 [1] : vector<16x16xf32> to vector<16xf32>
    %51 = vector.shape_cast %50 : vector<16xf32> to vector<16x1xf32>
    %52 = vector.broadcast %51 : vector<16x1xf32> to vector<16x16xf32>
    %53 = arith.subf %49, %52 : vector<16x16xf32>
    %54 = math.exp %53 : vector<16x16xf32>
    %cst_17 = arith.constant dense<0.000000e+00> : vector<16xf32>
    %55 = vector.multi_reduction <add>, %54, %cst_17 [1] : vector<16x16xf32> to vector<16xf32>
    %56 = vector.shape_cast %55 : vector<16xf32> to vector<16x1xf32>
    %57 = tpu.reciprocal %56 {approx = true} : vector<16x1xf32> -> vector<16x1xf32>
    %58 = vector.broadcast %57 : vector<16x1xf32> to vector<16x16xf32>
    %59 = arith.mulf %54, %58 : vector<16x16xf32>
    %60 = arith.truncf %59 : vector<16x16xf32> to vector<16x16xbf16>
    %61 = arith.truncf %44 : vector<16x16xf32> to vector<16x16xbf16>
    %cst_18 = arith.constant dense<0.000000e+00> : vector<16x16xf32>
    %62 = tpu.matmul %60, %61, %cst_18 {dimension_numbers = #tpu.dot_dimension_numbers<[1], [0], [0], [1], [0, 0, 1, 1], [], []>} : vector<16x16xbf16>, vector<16x16xbf16>, vector<16x16xf32> -> vector<16x16xf32>
    %63 = vector.extract_strided_slice %6 {offsets = [0, 16], sizes = [16, 16], strides = [1, 1]} : vector<16x192xf32> to vector<16x16xf32>
    %64 = vector.extract_strided_slice %6 {offsets = [0, 80], sizes = [16, 16], strides = [1, 1]} : vector<16x192xf32> to vector<16x16xf32>
    %65 = vector.extract_strided_slice %6 {offsets = [0, 144], sizes = [16, 16], strides = [1, 1]} : vector<16x192xf32> to vector<16x16xf32>
    %66 = arith.truncf %63 : vector<16x16xf32> to vector<16x16xbf16>
    %67 = arith.truncf %64 : vector<16x16xf32> to vector<16x16xbf16>
    "tpu.trace_start"() <{level = 10 : i32, message = "td,ud->tu"}> : () -> ()
    %cst_19 = arith.constant dense<0.000000e+00> : vector<16x16xf32>
    %68 = tpu.matmul %66, %67, %cst_19 {dimension_numbers = #tpu.dot_dimension_numbers<[1], [1], [0], [0], [0, 0, 1, 0], [], []>} : vector<16x16xbf16>, vector<16x16xbf16>, vector<16x16xf32> -> vector<16x16xf32>
    %cst_20 = arith.constant -1.000000e+30 : f32
    "tpu.trace_stop"() : () -> ()
    %69 = vector.broadcast %cst_20 : f32 to vector<16x16xf32>
    %70 = arith.select %41, %68, %69 : vector<16x16xi1>, vector<16x16xf32>
    %cst_21 = arith.constant dense<0xFF800000> : vector<16xf32>
    %71 = vector.multi_reduction <maximumf>, %70, %cst_21 [1] : vector<16x16xf32> to vector<16xf32>
    %72 = vector.shape_cast %71 : vector<16xf32> to vector<16x1xf32>
    %73 = vector.broadcast %72 : vector<16x1xf32> to vector<16x16xf32>
    %74 = arith.subf %70, %73 : vector<16x16xf32>
    %75 = math.exp %74 : vector<16x16xf32>
    %cst_22 = arith.constant dense<0.000000e+00> : vector<16xf32>
    %76 = vector.multi_reduction <add>, %75, %cst_22 [1] : vector<16x16xf32> to vector<16xf32>
    %77 = vector.shape_cast %76 : vector<16xf32> to vector<16x1xf32>
    %78 = tpu.reciprocal %77 {approx = true} : vector<16x1xf32> -> vector<16x1xf32>
    %79 = vector.broadcast %78 : vector<16x1xf32> to vector<16x16xf32>
    %80 = arith.mulf %75, %79 : vector<16x16xf32>
    %81 = arith.truncf %80 : vector<16x16xf32> to vector<16x16xbf16>
    %82 = arith.truncf %65 : vector<16x16xf32> to vector<16x16xbf16>
    %cst_23 = arith.constant dense<0.000000e+00> : vector<16x16xf32>
    %83 = tpu.matmul %81, %82, %cst_23 {dimension_numbers = #tpu.dot_dimension_numbers<[1], [0], [0], [1], [0, 0, 1, 1], [], []>} : vector<16x16xbf16>, vector<16x16xbf16>, vector<16x16xf32> -> vector<16x16xf32>
    %84 = vector.extract_strided_slice %6 {offsets = [0, 32], sizes = [16, 16], strides = [1, 1]} : vector<16x192xf32> to vector<16x16xf32>
    %85 = vector.extract_strided_slice %6 {offsets = [0, 96], sizes = [16, 16], strides = [1, 1]} : vector<16x192xf32> to vector<16x16xf32>
    %86 = vector.extract_strided_slice %6 {offsets = [0, 160], sizes = [16, 16], strides = [1, 1]} : vector<16x192xf32> to vector<16x16xf32>
    %87 = arith.truncf %84 : vector<16x16xf32> to vector<16x16xbf16>
    %88 = arith.truncf %85 : vector<16x16xf32> to vector<16x16xbf16>
    "tpu.trace_start"() <{level = 10 : i32, message = "td,ud->tu"}> : () -> ()
    %cst_24 = arith.constant dense<0.000000e+00> : vector<16x16xf32>
    %89 = tpu.matmul %87, %88, %cst_24 {dimension_numbers = #tpu.dot_dimension_numbers<[1], [1], [0], [0], [0, 0, 1, 0], [], []>} : vector<16x16xbf16>, vector<16x16xbf16>, vector<16x16xf32> -> vector<16x16xf32>
    %cst_25 = arith.constant -1.000000e+30 : f32
    "tpu.trace_stop"() : () -> ()
    %90 = vector.broadcast %cst_25 : f32 to vector<16x16xf32>
    %91 = arith.select %41, %89, %90 : vector<16x16xi1>, vector<16x16xf32>
    %cst_26 = arith.constant dense<0xFF800000> : vector<16xf32>
    %92 = vector.multi_reduction <maximumf>, %91, %cst_26 [1] : vector<16x16xf32> to vector<16xf32>
    %93 = vector.shape_cast %92 : vector<16xf32> to vector<16x1xf32>
    %94 = vector.broadcast %93 : vector<16x1xf32> to vector<16x16xf32>
    %95 = arith.subf %91, %94 : vector<16x16xf32>
    %96 = math.exp %95 : vector<16x16xf32>
    %cst_27 = arith.constant dense<0.000000e+00> : vector<16xf32>
    %97 = vector.multi_reduction <add>, %96, %cst_27 [1] : vector<16x16xf32> to vector<16xf32>
    %98 = vector.shape_cast %97 : vector<16xf32> to vector<16x1xf32>
    %99 = tpu.reciprocal %98 {approx = true} : vector<16x1xf32> -> vector<16x1xf32>
    %100 = vector.broadcast %99 : vector<16x1xf32> to vector<16x16xf32>
    %101 = arith.mulf %96, %100 : vector<16x16xf32>
    %102 = arith.truncf %101 : vector<16x16xf32> to vector<16x16xbf16>
    %103 = arith.truncf %86 : vector<16x16xf32> to vector<16x16xbf16>
    %cst_28 = arith.constant dense<0.000000e+00> : vector<16x16xf32>
    %104 = tpu.matmul %102, %103, %cst_28 {dimension_numbers = #tpu.dot_dimension_numbers<[1], [0], [0], [1], [0, 0, 1, 1], [], []>} : vector<16x16xbf16>, vector<16x16xbf16>, vector<16x16xf32> -> vector<16x16xf32>
    %105 = vector.extract_strided_slice %6 {offsets = [0, 48], sizes = [16, 16], strides = [1, 1]} : vector<16x192xf32> to vector<16x16xf32>
    %106 = vector.extract_strided_slice %6 {offsets = [0, 112], sizes = [16, 16], strides = [1, 1]} : vector<16x192xf32> to vector<16x16xf32>
    %107 = vector.extract_strided_slice %6 {offsets = [0, 176], sizes = [16, 16], strides = [1, 1]} : vector<16x192xf32> to vector<16x16xf32>
    %108 = arith.truncf %105 : vector<16x16xf32> to vector<16x16xbf16>
    %109 = arith.truncf %106 : vector<16x16xf32> to vector<16x16xbf16>
    "tpu.trace_start"() <{level = 10 : i32, message = "td,ud->tu"}> : () -> ()
    %cst_29 = arith.constant dense<0.000000e+00> : vector<16x16xf32>
    %110 = tpu.matmul %108, %109, %cst_29 {dimension_numbers = #tpu.dot_dimension_numbers<[1], [1], [0], [0], [0, 0, 1, 0], [], []>} : vector<16x16xbf16>, vector<16x16xbf16>, vector<16x16xf32> -> vector<16x16xf32>
    %cst_30 = arith.constant -1.000000e+30 : f32
    "tpu.trace_stop"() : () -> ()
    %111 = vector.broadcast %cst_30 : f32 to vector<16x16xf32>
    %112 = arith.select %41, %110, %111 : vector<16x16xi1>, vector<16x16xf32>
    %cst_31 = arith.constant dense<0xFF800000> : vector<16xf32>
    %113 = vector.multi_reduction <maximumf>, %112, %cst_31 [1] : vector<16x16xf32> to vector<16xf32>
    %114 = vector.shape_cast %113 : vector<16xf32> to vector<16x1xf32>
    %115 = vector.broadcast %114 : vector<16x1xf32> to vector<16x16xf32>
    %116 = arith.subf %112, %115 : vector<16x16xf32>
    %117 = math.exp %116 : vector<16x16xf32>
    %cst_32 = arith.constant dense<0.000000e+00> : vector<16xf32>
    %118 = vector.multi_reduction <add>, %117, %cst_32 [1] : vector<16x16xf32> to vector<16xf32>
    %119 = vector.shape_cast %118 : vector<16xf32> to vector<16x1xf32>
    %120 = tpu.reciprocal %119 {approx = true} : vector<16x1xf32> -> vector<16x1xf32>
    %121 = vector.broadcast %120 : vector<16x1xf32> to vector<16x16xf32>
    %122 = arith.mulf %117, %121 : vector<16x16xf32>
    %123 = arith.truncf %122 : vector<16x16xf32> to vector<16x16xbf16>
    %124 = arith.truncf %107 : vector<16x16xf32> to vector<16x16xbf16>
    %cst_33 = arith.constant dense<0.000000e+00> : vector<16x16xf32>
    %125 = tpu.matmul %123, %124, %cst_33 {dimension_numbers = #tpu.dot_dimension_numbers<[1], [0], [0], [1], [0, 0, 1, 1], [], []>} : vector<16x16xbf16>, vector<16x16xbf16>, vector<16x16xf32> -> vector<16x16xf32>
    %126 = tpu.concatenate %62, %83, %104, %125 in 1 : vector<16x16xf32>, vector<16x16xf32>, vector<16x16xf32>, vector<16x16xf32> -> vector<16x64xf32>
    %127 = arith.truncf %126 : vector<16x64xf32> to vector<16x64xbf16>
    %c0_34 = arith.constant 0 : index
    %c0_35 = arith.constant 0 : index
    %128 = vector.load %arg3[%c0_34, %c0_35] : memref<64x60xbf16, #tpu.memory_space<vmem>>, vector<64x60xbf16>
    %cst_36 = arith.constant dense<0.000000e+00> : vector<16x60xf32>
    %129 = tpu.matmul %127, %128, %cst_36 {dimension_numbers = #tpu.dot_dimension_numbers<[1], [0], [0], [1], [0, 0, 1, 1], [], []>} : vector<16x64xbf16>, vector<64x60xbf16>, vector<16x60xf32> -> vector<16x60xf32>
    %c0_37 = arith.constant 0 : index
    %c0_38 = arith.constant 0 : index
    %130 = vector.load %arg4[%c0_37, %c0_38] : memref<1x60xf32, #tpu.memory_space<vmem>>, vector<1x60xf32>
    %131 = vector.broadcast %130 : vector<1x60xf32> to vector<16x60xf32>
    %132 = arith.addf %129, %131 : vector<16x60xf32>
    %133 = arith.addf %0, %132 : vector<16x60xf32>
    %c0_39 = arith.constant 0 : index
    %c0_40 = arith.constant 0 : index
    %134 = vector.load %arg5[%c0_39, %c0_40] : memref<1x60xf32, #tpu.memory_space<vmem>>, vector<1x60xf32>
    %c0_41 = arith.constant 0 : index
    %c0_42 = arith.constant 0 : index
    %135 = vector.load %arg6[%c0_41, %c0_42] : memref<1x60xf32, #tpu.memory_space<vmem>>, vector<1x60xf32>
    %cst_43 = arith.constant dense<0.000000e+00> : vector<16xf32>
    %136 = vector.multi_reduction <add>, %133, %cst_43 [1] : vector<16x60xf32> to vector<16xf32>
    %137 = vector.shape_cast %136 : vector<16xf32> to vector<16x1xf32>
    %cst_44 = arith.constant 6.000000e+01 : f32
    %138 = vector.broadcast %cst_44 : f32 to vector<16x1xf32>
    %139 = arith.divf %137, %138 : vector<16x1xf32>
    %140 = vector.broadcast %139 : vector<16x1xf32> to vector<16x60xf32>
    %141 = arith.subf %133, %140 : vector<16x60xf32>
    %142 = arith.mulf %141, %141 : vector<16x60xf32>
    %cst_45 = arith.constant dense<0.000000e+00> : vector<16xf32>
    %143 = vector.multi_reduction <add>, %142, %cst_45 [1] : vector<16x60xf32> to vector<16xf32>
    %144 = vector.shape_cast %143 : vector<16xf32> to vector<16x1xf32>
    %cst_46 = arith.constant 6.000000e+01 : f32
    %145 = vector.broadcast %cst_46 : f32 to vector<16x1xf32>
    %146 = arith.divf %144, %145 : vector<16x1xf32>
    %147 = vector.broadcast %139 : vector<16x1xf32> to vector<16x60xf32>
    %148 = arith.subf %133, %147 : vector<16x60xf32>
    %cst_47 = arith.constant 9.99999974E-6 : f32
    %149 = vector.broadcast %cst_47 : f32 to vector<16x1xf32>
    %150 = arith.addf %146, %149 : vector<16x1xf32>
    %151 = math.rsqrt %150 : vector<16x1xf32>
    %152 = vector.broadcast %151 : vector<16x1xf32> to vector<16x60xf32>
    %153 = arith.mulf %148, %152 : vector<16x60xf32>
    %154 = vector.broadcast %134 : vector<1x60xf32> to vector<16x60xf32>
    %155 = arith.mulf %153, %154 : vector<16x60xf32>
    %156 = vector.broadcast %135 : vector<1x60xf32> to vector<16x60xf32>
    %157 = arith.addf %155, %156 : vector<16x60xf32>
    %158 = arith.truncf %157 : vector<16x60xf32> to vector<16x60xbf16>
    %c0_48 = arith.constant 0 : index
    %c0_49 = arith.constant 0 : index
    %159 = vector.load %arg7[%c0_48, %c0_49] : memref<60x64xbf16, #tpu.memory_space<vmem>>, vector<60x64xbf16>
    %cst_50 = arith.constant dense<0.000000e+00> : vector<16x64xf32>
    %160 = tpu.matmul %158, %159, %cst_50 {dimension_numbers = #tpu.dot_dimension_numbers<[1], [0], [0], [1], [0, 0, 1, 1], [], []>} : vector<16x60xbf16>, vector<60x64xbf16>, vector<16x64xf32> -> vector<16x64xf32>
    %c0_51 = arith.constant 0 : index
    %c0_52 = arith.constant 0 : index
    %161 = vector.load %arg8[%c0_51, %c0_52] : memref<1x64xf32, #tpu.memory_space<vmem>>, vector<1x64xf32>
    %162 = vector.broadcast %161 : vector<1x64xf32> to vector<16x64xf32>
    %163 = arith.addf %160, %162 : vector<16x64xf32>
    %164 = arith.truncf %163 : vector<16x64xf32> to vector<16x64xbf16>
    %c0_53 = arith.constant 0 : index
    %c0_54 = arith.constant 0 : index
    %165 = vector.load %arg9[%c0_53, %c0_54] : memref<64x60xbf16, #tpu.memory_space<vmem>>, vector<64x60xbf16>
    %cst_55 = arith.constant dense<0.000000e+00> : vector<16x60xf32>
    %166 = tpu.matmul %164, %165, %cst_55 {dimension_numbers = #tpu.dot_dimension_numbers<[1], [0], [0], [1], [0, 0, 1, 1], [], []>} : vector<16x64xbf16>, vector<64x60xbf16>, vector<16x60xf32> -> vector<16x60xf32>
    %c0_56 = arith.constant 0 : index
    %c0_57 = arith.constant 0 : index
    %167 = vector.load %arg10[%c0_56, %c0_57] : memref<1x60xf32, #tpu.memory_space<vmem>>, vector<1x60xf32>
    %168 = vector.broadcast %167 : vector<1x60xf32> to vector<16x60xf32>
    %169 = arith.addf %166, %168 : vector<16x60xf32>
    %170 = arith.addf %157, %169 : vector<16x60xf32>
    %c0_58 = arith.constant 0 : index
    %c0_59 = arith.constant 0 : index
    %171 = vector.load %arg11[%c0_58, %c0_59] : memref<1x60xf32, #tpu.memory_space<vmem>>, vector<1x60xf32>
    %c0_60 = arith.constant 0 : index
    %c0_61 = arith.constant 0 : index
    %172 = vector.load %arg12[%c0_60, %c0_61] : memref<1x60xf32, #tpu.memory_space<vmem>>, vector<1x60xf32>
    %cst_62 = arith.constant dense<0.000000e+00> : vector<16xf32>
    %173 = vector.multi_reduction <add>, %170, %cst_62 [1] : vector<16x60xf32> to vector<16xf32>
    %174 = vector.shape_cast %173 : vector<16xf32> to vector<16x1xf32>
    %cst_63 = arith.constant 6.000000e+01 : f32
    %175 = vector.broadcast %cst_63 : f32 to vector<16x1xf32>
    %176 = arith.divf %174, %175 : vector<16x1xf32>
    %177 = vector.broadcast %176 : vector<16x1xf32> to vector<16x60xf32>
    %178 = arith.subf %170, %177 : vector<16x60xf32>
    %179 = arith.mulf %178, %178 : vector<16x60xf32>
    %cst_64 = arith.constant dense<0.000000e+00> : vector<16xf32>
    %180 = vector.multi_reduction <add>, %179, %cst_64 [1] : vector<16x60xf32> to vector<16xf32>
    %181 = vector.shape_cast %180 : vector<16xf32> to vector<16x1xf32>
    %cst_65 = arith.constant 6.000000e+01 : f32
    %182 = vector.broadcast %cst_65 : f32 to vector<16x1xf32>
    %183 = arith.divf %181, %182 : vector<16x1xf32>
    %184 = vector.broadcast %176 : vector<16x1xf32> to vector<16x60xf32>
    %185 = arith.subf %170, %184 : vector<16x60xf32>
    %cst_66 = arith.constant 9.99999974E-6 : f32
    %186 = vector.broadcast %cst_66 : f32 to vector<16x1xf32>
    %187 = arith.addf %183, %186 : vector<16x1xf32>
    %188 = math.rsqrt %187 : vector<16x1xf32>
    %189 = vector.broadcast %188 : vector<16x1xf32> to vector<16x60xf32>
    %190 = arith.mulf %185, %189 : vector<16x60xf32>
    %191 = vector.broadcast %171 : vector<1x60xf32> to vector<16x60xf32>
    %192 = arith.mulf %190, %191 : vector<16x60xf32>
    %193 = vector.broadcast %172 : vector<1x60xf32> to vector<16x60xf32>
    %194 = arith.addf %192, %193 : vector<16x60xf32>
    %c0_67 = arith.constant 0 : index
    %c0_68 = arith.constant 0 : index
    %195 = vector.load %arg13[%c0_67, %c0_68] : memref<16x60xf32, #tpu.memory_space<vmem>>, vector<16x60xf32>
    tpu.vector_store %arg13[%c0_67, %c0_68], %194 {strides = array<i32>} : memref<16x60xf32, #tpu.memory_space<vmem>>, vector<16x60xf32>,
    return
  }
}

</mosaic_0001>

<bundles_post_ra>
// kernel: tpu_custom_call.1
= control target key start
LH: loop header
LB: loop body
LE: loop exit
PB: predicated region body
PF: predicated region fallthrough
CT: control target
= control target key end

     0   :  { %18 = vsyncpa [#allocation3], 0  ;;  %s1528_s0 = inlined_call_operand.hbm [shape: f32[16,60], index: 0, kind: input, shape index: {}]   ;;  %s1529_s1 = inlined_call_operand.hbm [shape: bf16[60,192], index: 1, kind: input, shape index: {}]   ;;  %s1530_s2 = inlined_call_operand.hbm [shape: f32[1,192], index: 2, kind: input, shape index: {}]   ;;  %s1531_s3 = inlined_call_operand.hbm [shape: bf16[64,60], index: 3, kind: input, shape index: {}]   ;;  %s1532_s4 = inlined_call_operand.vmem [shape: f32[1,60], index: 4, kind: input, shape index: {}]   ;;  %s1533_s5 = inlined_call_operand.vmem [shape: f32[1,60], index: 5, kind: input, shape index: {}]   ;;  %s1534_s6 = inlined_call_operand.vmem [shape: f32[1,60], index: 6, kind: input, shape index: {}]   ;;  %s1535_s7 = inlined_call_operand.hbm [shape: bf16[60,64], index: 7, kind: input, shape index: {}]   ;;  %s1536_s8 = inlined_call_operand.vmem [shape: f32[1,64], index: 8, kind: input, shape index: {}]   ;;  %s1537_s9 = inlined_call_operand.hbm [shape: bf16[64,60], index: 9, kind: input, shape index: {}]   ;;  %s1538_s10 = inlined_call_operand.vmem [shape: f32[1,60], index: 10, kind: input, shape index: {}]   ;;  %s1539_s11 = inlined_call_operand.vmem [shape: f32[1,60], index: 11, kind: input, shape index: {}]   ;;  %s1540_s12 = inlined_call_operand.vmem [shape: f32[1,60], index: 12, kind: input, shape index: {}]   ;;  %s1541_s13 = inlined_call_operand.hbm [shape: f32[16,60], index: 13, kind: output, shape index: {}]  }
   0x1   :  { %19 = vsyncpa [#allocation6], 0 }
   0x2   :  { %20 = vsyncpa [#allocation9], 0 }
   0x3   :  { %21 = vsyncpa [#allocation12], 0 }
   0x4   :  { %22 = vsyncpa [#allocation4], 0  ;;  %s40_s27 = sshll.u32 %s1529_s1, 4  ;;  %s1268_s28 = smov [#allocation5]   ;;  %s41_s27 = int_to_ptr.hbm [resolvable:$true] %s40_s27 }
   0x5   :  { %s42_s29 = sshll.u32 %s1268_s28, 4  ;;  %s64_s15 = sshll.u32 %s1531_s3, 4  ;;  %s43_s29 = int_to_ptr.vmem [resolvable:$true] %s42_s29  ;;  %s65_s15 = int_to_ptr.hbm [resolvable:$true] %s64_s15 }
   0x6   :  { %s1269_s16 = smov 128   ;;  %s1270_s17 = smov 8  }
   0x7   :  { %48 = dma.hbm_to_vmem [thread:$0]  %s41_s27, 1024, %s43_s29, [#allocation6], %s1269_s16, %s1269_s16, %s1270_s17  }
   0x8   :  { %s1271_s18 = smov [#allocation8]   ;;  %s1272_s20 = smov 64  }
   0x9   :  { %s66_s19 = sshll.u32 %s1271_s18, 4  ;;  %s1273_s1 = smov 4   ;;  %s67_s19 = int_to_ptr.vmem [resolvable:$true] %s66_s19 }
   0xa   :  { %72 = dma.hbm_to_vmem [thread:$0]  %s65_s15, 512, %s67_s19, [#allocation9], %s1272_s20, %s1272_s20, %s1273_s1  }
   0xb   :  { %s27_s23 = sshll.u32 %s1528_s0, 4  ;;  %s1274_s3 = smov [#allocation2]   ;;  %s28_s23 = int_to_ptr.hbm [resolvable:$true] %s27_s23 }
   0xc   :  { %s29_s24 = sshll.u32 %s1274_s3, 4  ;;  %s54_s27 = sshll.u32 %s1530_s2, 4  ;;  %s30_s24 = int_to_ptr.vmem [resolvable:$true] %s29_s24  ;;  %s55_s27 = int_to_ptr.hbm [resolvable:$true] %s54_s27 }
   0xd   :  { %35 = dma.hbm_to_vmem [thread:$0]  %s28_s23, 256, %s30_s24, [#allocation3], %s1269_s16, %s1269_s16, %s1270_s17  }
   0xe   :  { %s1275_s28 = smov [#allocation7]   ;;  %s83_s15 = sshll.u32 %s1535_s7, 4  ;;  %s84_s15 = int_to_ptr.hbm [resolvable:$true] %s83_s15 }
   0xf   :  { %s56_s29 = sshll.u32 %s1275_s28, 4  ;;  %s98_s19 = sshll.u32 %s1537_s9, 4  ;;  %s57_s29 = int_to_ptr.vmem [resolvable:$true] %s56_s29  ;;  %s99_s19 = int_to_ptr.hbm [resolvable:$true] %s98_s19 }
  0x10   :  { %59 = dma.hbm_to_vmem [thread:$0]  %s55_s27, 32, %s57_s29, [#allocation6]  }
  0x11   :  { %s1276_s21 = smov [#allocation10]   ;;  %s1277_s22 = smov [#allocation11]  }
  0x12   :  { %s85_s2 = sshll.u32 %s1276_s21, 4  ;;  %s100_s23 = sshll.u32 %s1277_s22, 4  ;;  %s86_s2 = int_to_ptr.vmem [resolvable:$true] %s85_s2  ;;  %s101_s23 = int_to_ptr.vmem [resolvable:$true] %s100_s23 }
  0x13   :  { %91 = dma.hbm_to_vmem [thread:$0]  %s84_s15, 512, %s86_s2, [#allocation9], %s1272_s20, %s1272_s20, %s1273_s1  }
  0x14   :  { %106 = dma.hbm_to_vmem [thread:$0]  %s99_s19, 512, %s101_s23, [#allocation12], %s1272_s20, %s1272_s20, %s1273_s1  }
  0x15   :  { %1258 = dma.done.wait [#allocation3], 256  }
  0x16   :  { %1259 = vsyncadd [#allocation3], 4294967040 }
  0x17   :  { %1260 = dma.done.wait [#allocation6], 1056  }
  0x18   :  { %1261 = vsyncadd [#allocation6], 4294966240 }
  0x19   :  { %1262 = dma.done.wait [#allocation9], 1024  }
  0x1a   :  { %1263 = vsyncadd [#allocation9], 4294966272 }
  0x1b   :  { %1264 = dma.done.wait [#allocation12], 512  }
  0x1c   :  { %1265 = vsyncadd [#allocation12], 4294966784  ;;  %v921_v0 = vld [vmem:[#allocation5 + $0x30] sm:$0xf]  ;;  %v995_v1 = vld [vmem:[#allocation5 + $0x34] sm:$0x30]  ;;  %v232_v46 = vlaneseq }
  0x1d   :  { %vm197_vm0 = vcmask 1045504   ;;  %v922_v2 = vor.u32 %v995_v1, %v921_v0  ;;  %v913_v3 = vld [vmem:[#allocation5 + $0x20] sm:$0xf]  ;;  %v993_v4 = vld [vmem:[#allocation5 + $0x24] sm:$0xf0]  ;;  %v1388_v21 = vld [vmem:[#allocation2] sm:$0xff] }
  0x1e   :  { %v994_v6 = vld [vmem:[#allocation5 + $0x34] sm:$0xf]  ;;  %v923_v7 = vld [vmem:[#allocation5 + $0x38] sm:$0x30]  ;;  %v914_v8 = vor.u32 %v993_v4, %v913_v3  ;;  %v992_v10 = vld [vmem:[#allocation5 + $0x24] sm:$0xf] }
  0x1f   :  { %v199_v5 = vsel %vm197_vm0, %v922_v2, 0  ;;  %v926_v9 = vor.u32 %v994_v6, %v923_v7  ;;  %v915_v11 = vld [vmem:[#allocation5 + $0x28] sm:$0xf0]  ;;  %v905_v12 = vld [vmem:[#allocation5 + $0x10] sm:$0xf]  ;;  %v1390_v24 = vld [vmem:[#allocation2 + $0x8] sm:$0xff] }
  0x20   :  { %208 = vmatpush.bf16.msra.mxu0 %v199_v5  ;;  %v991_v13 = vld [vmem:[#allocation5 + $0x14] sm:$0xf0]  ;;  %v990_v15 = vld [vmem:[#allocation5 + $0x14] sm:$0xf]  ;;  %v918_v16 = vor.u32 %v992_v10, %v915_v11  ;;  %v907_v17 = vld [vmem:[#allocation5 + $0x18] sm:$0xf0]  ;;  %v140_v27 = vpack.c.bf16 %v1390_v24, %v1388_v21 }
  0x21   :  { %v202_v14 = vsel %vm197_vm0, %v926_v9, 0  ;;  %v906_v18 = vor.u32 %v991_v13, %v905_v12  ;;  %v897_v19 = vld [vmem:[#allocation5] sm:$0xf]  ;;  %v989_v20 = vld [vmem:[#allocation5 + $0x4] sm:$0xf0]  ;;  %v910_v22 = vor.u32 %v990_v15, %v907_v17  ;;  %vm193_vm1 = vcmask 490496  }
  0x22   :  { %222 = vmatpush.bf16.msra.mxu1 %v202_v14  ;;  %v898_v23 = vor.u32 %v989_v20, %v897_v19  ;;  %v988_v25 = vld [vmem:[#allocation5 + $0x4] sm:$0xf]  ;;  %v899_v26 = vld [vmem:[#allocation5 + $0x8] sm:$0xf0]  ;;  %v149_v30 = vld [vmem:[#allocation7] sm:$0x3] }
  0x23   :  { %v902_v28 = vor.u32 %v988_v25, %v899_v26  ;;  %v151_v32 = vperm.slane %v149_v30, 0  ;;  %v152_v33 = vperm.slane %v149_v30, 1  ;;  %s1278_s7 = smov 48   ;;  %vm279_vm2 = vcmask 130048   ;;  %s1279_s9 = smov 112  }
  0x24   :  { %209 = vmatpush.bf16.msra.mxu0 %v914_v8  ;;  %v233_v47 = vshrl.u32 %v232_v46, 7  ;;  %v236_v48 = vand.u32 127, %v232_v46  ;;  %s1281_s1 = smov 32   ;;  %s1282_s3 = smov 80   ;;  %vm577_vm5 = vcmask 261120   ;;  %vm580_vm6 = vcmask 392192  }
  0x25   :  { %s1283_s24 = smov 96   ;;  %vm620_vm7 = vcmask 523264   ;;  %s879_s2 = sshll.u32 %s1541_s13, 4  ;;  %s880_s2 = int_to_ptr.hbm [resolvable:$true] %s879_s2 }
  0x26   :  { %223 = vmatpush.bf16.msra.mxu1 %v918_v16  ;;  %v241_v49 = vand.u32 1, %v233_v47  ;;  %v265_v50 = vand.u32 1, %v236_v48  ;;  %v234_v52 = vadd.s32 8, %v233_v47 }
  0x28   :  { %210 = vmatpush.bf16.msra.mxu0 %v906_v18  ;;  %vm1404_vm3 = vcmp.eq.s32.totalorder %v241_v49, %v265_v50  ;;  %v248_v56 = vand.u32 1, %v234_v52 }
  0x2a   :  { %224 = vmatpush.bf16.msra.mxu1 %v910_v22  ;;  %vm1411_vm4 = vcmp.eq.s32.totalorder %v248_v56, %v265_v50 }
  0x2c   :  { %211 = vmatpush.bf16.msra.mxu0 %v898_v23 }
  0x2e   :  { %225 = vmatpush.bf16.msra.mxu1 %v902_v28 }
  0x2f   :  { %927 = vmatmul.msk.bf16.vlgmr.msra.gmra.mxu0 %vm193_vm1, %v140_v27 }
  0x31   :  { %928 = vmatmul.msk.bf16.vlgmr.msra.gmra.mxu1 %vm193_vm1, %v140_v27 }
  0xac   :  { %v213_v29 = vpop.f32.mrf.mxu0 }
  0xad   :  { %v214_v35 = vadd.f32 %v213_v29, %v151_v32 }
  0xae   :  { %v227_v31 = vpop.f32.mrf.mxu1 }
  0xaf   :  { %v228_v37 = vadd.f32 %v227_v31, %v152_v33 }
  0xb4   :  { %v215_v34 = vpop.f32.mrf.mxu0 }
  0xb5   :  { %v216_v36 = vadd.f32 %v215_v34, %v151_v32 }
  0xb6   :  { %v229_v39 = vpop.f32.mrf.mxu1 }
  0xb7   :  { %v275_v38 = vpack.c.bf16 %v216_v36, %v214_v35  ;;  %v230_v40 = vadd.f32 %v229_v39, %v152_v33 }
  0xb9   :  { %345 = vrot.lane.b32.xlu2 %v275_v38, %s1278_s7  ;;  %277 = vrot.lane.b32.xlu0 %v275_v38, %s1272_s20  ;;  %v1398_v41 = vpack.c.bf16 %v230_v40, %v228_v37  ;;  %s1280_s20 = smov 16  }
  0xbb   :  { %336 = vmatpush.bf16.msra.mxu3 %v1398_v41 }
 0x113   :  { %v346_v42 = vpop.permute.xlu2 %345 }
 0x114   :  { %v351_v43 = vsel %vm279_vm2, %v346_v42, 0 }
 0x115   :  { %360 = vmatpush.bf16.xpose.msrb.mxu3 %v351_v43 }
 0x12b   :  { %v278_v44 = vpop.permute.xlu0 %277 }
 0x12c   :  { %v284_v45 = vsel %vm279_vm2, %v278_v44, 0 }
 0x12d   :  { %293 = vmatpush.bf16.xpose.msra.mxu2 %v284_v45 }
 0x134   :  { %929 = vmatmul.msk.bf16.vlgmr.msra.gmra.mxu2 %vm279_vm2, %v275_v38 }
 0x1b7   :  { %v295_v53 = vpop.f32.mrf.mxu2 }
 0x1b8   :  { %v300_v54 = vsel %vm1404_vm3, %v295_v53, -1e+30 }
 0x1b9   :  { %v302_v55 = vsel %vm279_vm2, %v300_v54, -inf }
 0x1ba   :  { %303 = vmax.xlane.f32.xlu0 %v302_v55 }
 0x1bf   :  { %v297_v58 = vpop.f32.mrf.mxu2 }
 0x1c0   :  { %v301_v59 = vsel %vm1411_vm4, %v297_v58, -1e+30 }
 0x1c1   :  { %v305_v60 = vsel %vm279_vm2, %v301_v59, -inf }
 0x1c2   :  { %306 = vmax.xlane.f32.xlu1 %v305_v60 }
 0x22d   :  { %v304_v61 = vpop.xlane.xlu0 %303 }
 0x22e   :  { %v308_v62 = vsub.f32 %v300_v54, %v304_v61 }
 0x230   :  { %v310_v63 = vmul.f32 1.442695, %v308_v62 }
 0x232   :  { %1048 = vpow2.f32 %v310_v63 }
 0x235   :  { %v307_v0 = vpop.xlane.xlu1 %306 }
 0x236   :  { %v309_v1 = vsub.f32 %v301_v59, %v307_v0 }
 0x238   :  { %v1049_v2 = vpop.eup %1048  ;;  %v312_v3 = vmul.f32 1.442695, %v309_v1 }
 0x239   :  { %v314_v4 = vsel %vm279_vm2, %v1049_v2, 0.0 }
 0x23a   :  { %1050 = vpow2.f32 %v312_v3  ;;  %315 = vadd.xlane.f32.xlu1 %v314_v4 }
 0x240   :  { %v1051_v5 = vpop.eup %1050 }
 0x241   :  { %v317_v6 = vsel %vm279_vm2, %v1051_v5, 0.0 }
 0x242   :  { %318 = vadd.xlane.f32.xlu2 %v317_v6 }
 0x253   :  { %343 = vrot.lane.b32.xlu1 %v275_v38, %s1279_s9 }
 0x25a   :  { %484 = vrot.lane.b32.xlu2 %v275_v38, %s1280_s20 }
 0x25b   :  { %415 = vrot.lane.b32.xlu1 %v275_v38, %s1281_s1 }
 0x262   :  { %482 = vrot.lane.b32.xlu2 %v275_v38, %s1282_s3 }
 0x26a   :  { %413 = vrot.lane.b32.xlu2 %v275_v38, %s1283_s24 }
 0x2ad   :  { %v316_v7 = vpop.xlane.xlu1 %315 }
 0x2ae   :  { %1052 = vrcp.f32 %v316_v7 }
 0x2b4   :  { %v1053_v9 = vpop.eup %1052 }
 0x2b5   :  { %v319_v8 = vpop.xlane.xlu2 %318  ;;  %v322_v11 = vmul.f32 %v1053_v9, %v1049_v2 }
 0x2b6   :  { %1054 = vrcp.f32 %v319_v8 }
 0x2bc   :  { %v1055_v10 = vpop.eup %1054 }
 0x2bd   :  { %v323_v12 = vmul.f32 %v1055_v10, %v1051_v5  ;;  %v485_v13 = vpop.permute.xlu2 %484 }
 0x2be   :  { %v490_v15 = vsel %vm279_vm2, %v485_v13, 0 }
 0x2bf   :  { %v324_v14 = vpack.c.bf16 %v323_v12, %v322_v11 }
 0x2c1   :  { %930 = vmatmul.msk.bf16.vlgmr.msra.gmra.mxu3 %vm279_vm2, %v324_v14 }
 0x2c2   :  { %499 = vmatpush.bf16.xpose.msra.mxu3 %v490_v15 }
 0x2c5   :  { %v344_v16 = vpop.permute.xlu1 %343  ;;  %v483_v17 = vpop.permute.xlu2 %482 }
 0x2cd   :  { %v416_v18 = vpop.permute.xlu1 %415  ;;  %v414_v20 = vpop.permute.xlu2 %413 }
 0x2ce   :  { %v421_v19 = vsel %vm279_vm2, %v416_v18, 0 }
 0x2cf   :  { %430 = vmatpush.bf16.xpose.msrb.mxu0 %v421_v19 }
 0x2d1   :  { %931 = vmatmul.msk.bf16.vlgmr.msrb.gmra.mxu3 %vm279_vm2, %v344_v16 }
 0x2d6   :  { %933 = vmatmul.msk.bf16.vlgmr.msrb.gmra.mxu0 %vm279_vm2, %v414_v20 }
 0x2e1   :  { %935 = vmatmul.msk.bf16.vlgmr.msra.gmra.mxu3 %vm279_vm2, %v483_v17 }
 0x344   :  { %v1431_v22 = vpop.f32.mrf.mxu3 }
 0x34c   :  { %v1433_v23 = vpop.f32.mrf.mxu3 }
 0x353   :  { %v432_v30 = vpop.f32.mrf.mxu0 }
 0x354   :  { %v362_v25 = vpop.f32.mrf.mxu3  ;;  %v437_v32 = vsel %vm1404_vm3, %v432_v30, -1e+30 }
 0x355   :  { %v367_v26 = vsel %vm1404_vm3, %v362_v25, -1e+30  ;;  %v439_v36 = vsel %vm279_vm2, %v437_v32, -inf }
 0x356   :  { %v369_v27 = vsel %vm279_vm2, %v367_v26, -inf }
 0x357   :  { %370 = vmax.xlane.f32.xlu1 %v369_v27 }
 0x35b   :  { %v434_v37 = vpop.f32.mrf.mxu0 }
 0x35c   :  { %v364_v28 = vpop.f32.mrf.mxu3  ;;  %v438_v38 = vsel %vm1411_vm4, %v434_v37, -1e+30 }
 0x35d   :  { %v368_v29 = vsel %vm1411_vm4, %v364_v28, -1e+30  ;;  %v442_v39 = vsel %vm279_vm2, %v438_v38, -inf }
 0x35e   :  { %v372_v31 = vsel %vm279_vm2, %v368_v29, -inf }
 0x35f   :  { %373 = vmax.xlane.f32.xlu0 %v372_v31 }
 0x364   :  { %v501_v33 = vpop.f32.mrf.mxu3 }
 0x365   :  { %v506_v34 = vsel %vm1404_vm3, %v501_v33, -1e+30 }
 0x366   :  { %v508_v35 = vsel %vm279_vm2, %v506_v34, -inf }
 0x367   :  { %509 = vmax.xlane.f32.xlu2 %v508_v35  ;;  %440 = vmax.xlane.f32.xlu0 %v439_v36 }
 0x36c   :  { %v503_v61 = vpop.f32.mrf.mxu3 }
 0x36d   :  { %v507_v63 = vsel %vm1411_vm4, %v503_v61, -1e+30 }
 0x36e   :  { %v511_v1 = vsel %vm279_vm2, %v507_v63, -inf }
 0x36f   :  { %443 = vmax.xlane.f32.xlu0 %v442_v39 }
 0x370   :  { %393 = vrot.lane.b32.xlu1 %v1398_v41, %s1279_s9 }
 0x3ca   :  { %v371_v42 = vpop.xlane.xlu1 %370 }
 0x3cb   :  { %v375_v58 = vsub.f32 %v367_v26, %v371_v42 }
 0x3cd   :  { %v377_v62 = vmul.f32 1.442695, %v375_v58 }
 0x3d2   :  { %v374_v40 = vpop.xlane.xlu0 %373 }
 0x3d3   :  { %v376_v0 = vsub.f32 %v368_v29, %v374_v40 }
 0x3d5   :  { %v379_v2 = vmul.f32 1.442695, %v376_v0 }
 0x3da   :  { %v441_v43 = vpop.xlane.xlu0 %440  ;;  %v510_v44 = vpop.xlane.xlu2 %509 }
 0x3db   :  { %v445_v45 = vsub.f32 %v437_v32, %v441_v43  ;;  %v514_v47 = vsub.f32 %v506_v34, %v510_v44 }
 0x3dd   :  { %v447_v46 = vmul.f32 1.442695, %v445_v45  ;;  %v516_v48 = vmul.f32 1.442695, %v514_v47  ;;  %v999_v47 = vld [vmem:[#allocation8 + $0x18] sm:$0xff] }
 0x3de   :  { %628 = vmatpush.bf16.msra.mxu0 %v999_v47 }
 0x3df   :  { %1056 = vpow2.f32 %v447_v46 }
 0x3e0   :  { %1058 = vpow2.f32 %v516_v48  ;;  %v998_v48 = vld [vmem:[#allocation8 + $0x10] sm:$0xff] }
 0x3e2   :  { %v444_v49 = vpop.xlane.xlu0 %443  ;;  %v394_v50 = vpop.permute.xlu1 %393  ;;  %629 = vmatpush.bf16.msra.mxu0 %v998_v48 }
 0x3e3   :  { %v446_v51 = vsub.f32 %v438_v38, %v444_v49  ;;  %406 = vmatpush.bf16.msrb.mxu2 %v394_v50  ;;  %v997_v49 = vld [vmem:[#allocation8 + $0x8] sm:$0xff]  ;;  %v996_v50 = vld [vmem:[#allocation8] sm:$0xff] }
 0x3e5   :  { %v449_v52 = vmul.f32 1.442695, %v446_v51  ;;  %v1057_v53 = vpop.eup %1056 }
 0x3e6   :  { %v451_v54 = vsel %vm279_vm2, %v1057_v53, 0.0  ;;  %v1059_v55 = vpop.eup %1058  ;;  %630 = vmatpush.bf16.msra.mxu0 %v997_v49 }
 0x3e7   :  { %1060 = vpow2.f32 %v449_v52  ;;  %452 = vadd.xlane.f32.xlu2 %v451_v54  ;;  %v520_v60 = vsel %vm279_vm2, %v1059_v55, 0.0 }
 0x3e8   :  { %1062 = vpow2.f32 %v377_v62 }
 0x3e9   :  { %1064 = vpow2.f32 %v379_v2 }
 0x3ea   :  { %631 = vmatpush.bf16.msra.mxu0 %v996_v50 }
 0x3ed   :  { %v1061_v56 = vpop.eup %1060 }
 0x3ee   :  { %v454_v59 = vsel %vm279_vm2, %v1061_v56, 0.0  ;;  %v1063_v3 = vpop.eup %1062 }
 0x3ef   :  { %455 = vadd.xlane.f32.xlu0 %v454_v59  ;;  %521 = vadd.xlane.f32.xlu2 %v520_v60  ;;  %v381_v4 = vsel %vm279_vm2, %v1063_v3, 0.0  ;;  %v1065_v5 = vpop.eup %1064 }
 0x3f0   :  { %v384_v6 = vsel %vm279_vm2, %v1065_v5, 0.0 }
 0x3f7   :  { %512 = vmax.xlane.f32.xlu0 %v511_v1 }
 0x3ff   :  { %382 = vadd.xlane.f32.xlu0 %v381_v4 }
 0x407   :  { %385 = vadd.xlane.f32.xlu0 %v384_v6  ;;  %531 = vrot.lane.b32.xlu2 %v1398_v41, %s1282_s3 }
 0x45a   :  { %v453_v57 = vpop.xlane.xlu2 %452 }
 0x45b   :  { %1066 = vrcp.f32 %v453_v57 }
 0x461   :  { %v1067_v9 = vpop.eup %1066 }
 0x462   :  { %v456_v7 = vpop.xlane.xlu0 %455  ;;  %v522_v8 = vpop.xlane.xlu2 %521  ;;  %v459_v11 = vmul.f32 %v1067_v9, %v1057_v53 }
 0x463   :  { %1068 = vrcp.f32 %v456_v7 }
 0x469   :  { %v1069_v10 = vpop.eup %1068 }
 0x46a   :  { %v460_v12 = vmul.f32 %v1069_v10, %v1061_v56  ;;  %v513_v13 = vpop.xlane.xlu0 %512  ;;  %v532_v14 = vpop.permute.xlu2 %531  ;;  %v1284_v10 = vmov 60.0  }
 0x46b   :  { %v515_v15 = vsub.f32 %v507_v63, %v513_v13  ;;  %544 = vmatpush.bf16.msra.mxu2 %v532_v14 }
 0x46c   :  { %v461_v16 = vpack.c.bf16 %v460_v12, %v459_v11 }
 0x46d   :  { %v518_v17 = vmul.f32 1.442695, %v515_v15 }
 0x46f   :  { %1070 = vpow2.f32 %v518_v17 }
 0x472   :  { %v383_v18 = vpop.xlane.xlu0 %382 }
 0x473   :  { %1072 = vrcp.f32 %v383_v18 }
 0x475   :  { %v1071_v19 = vpop.eup %1070 }
 0x476   :  { %v523_v20 = vsel %vm279_vm2, %v1071_v19, 0.0 }
 0x477   :  { %524 = vadd.xlane.f32.xlu0 %v523_v20 }
 0x479   :  { %v1073_v26 = vpop.eup %1072 }
 0x47a   :  { %v386_v25 = vpop.xlane.xlu0 %385  ;;  %v389_v28 = vmul.f32 %v1073_v26, %v1063_v3 }
 0x47b   :  { %1074 = vrcp.f32 %v386_v25 }
 0x47c   :  { %1076 = vrcp.f32 %v522_v8 }
 0x481   :  { %v1075_v27 = vpop.eup %1074 }
 0x482   :  { %v390_v29 = vmul.f32 %v1075_v27, %v1065_v5  ;;  %v1077_v32 = vpop.eup %1076 }
 0x483   :  { %v528_v34 = vmul.f32 %v1077_v32, %v1059_v55 }
 0x484   :  { %v391_v30 = vpack.c.bf16 %v390_v29, %v389_v28  ;;  %v968_v29 = vld [vmem:[#allocation10 + $0x18] sm:$0xf] }
 0x486   :  { %932 = vmatmul.msk.bf16.vlgmr.msrb.gmra.mxu2 %vm279_vm2, %v391_v30  ;;  %v1003_v30 = vld [vmem:[#allocation10 + $0x18] sm:$0x30] }
 0x48b   :  { %462 = vrot.lane.b32.xlu0 %v1398_v41, %s1283_s24 }
 0x4ea   :  { %v525_v31 = vpop.xlane.xlu0 %524 }
 0x4eb   :  { %1078 = vrcp.f32 %v525_v31  ;;  %v969_v31 = vor.u32 %v1003_v30, %v968_v29 }
 0x4ec   :  { %1080 = vrcp.f32 %v1284_v10 }
 0x4ed   :  { %v743_v32 = vsel %vm197_vm0, %v969_v31, 0 }
 0x4f1   :  { %v1079_v33 = vpop.eup %1078 }
 0x4f2   :  { %v529_v35 = vmul.f32 %v1079_v33, %v1071_v19  ;;  %v1081_v11 = vpop.eup %1080  ;;  %v1002_v33 = vld [vmem:[#allocation10 + $0x10] sm:$0xff] }
 0x4f3   :  { %v649_v12 = vmul.f32 60.0, %v1081_v11  ;;  %vm653_vm8 = vweird.f32 %v1081_v11 }
 0x4f4   :  { %v530_v36 = vpack.c.bf16 %v529_v35, %v528_v34  ;;  %v1001_v34 = vld [vmem:[#allocation10 + $0x8] sm:$0xff] }
 0x4f5   :  { %v650_v13 = vsub.f32 1.0, %v649_v12 }
 0x4f6   :  { %936 = vmatmul.msk.bf16.vlgmr.msra.gmra.mxu2 %vm279_vm2, %v530_v36 }
 0x4f7   :  { %v651_v14 = vmul.f32 %v1081_v11, %v650_v13 }
 0x4f9   :  { %v652_v15 = vadd.f32 %v1081_v11, %v651_v14 }
 0x4fd   :  { %v463_v37 = vpop.permute.xlu0 %462 }
 0x4fe   :  { %475 = vmatpush.bf16.msrb.mxu1 %v463_v37 }
 0x501   :  { %934 = vmatmul.msk.bf16.vlgmr.msrb.gmra.mxu1 %vm279_vm2, %v461_v16  ;;  %v1483_v16 = vsel %vm653_vm8, %v1081_v11, %v652_v15 }
 0x502   :  { %749 = vmatpush.bf16.msra.mxu1 %v743_v32 }
 0x506   :  { %750 = vmatpush.bf16.msra.mxu1 %v1002_v33 }
 0x509   :  { %v408_v38 = vpop.f32.mrf.mxu2 }
 0x50a   :  { %751 = vmatpush.bf16.msra.mxu1 %v1001_v34 }
 0x511   :  { %v410_v40 = vpop.f32.mrf.mxu2 }
 0x512   :  { %v1031_v44 = vpack.i.bf16 %v410_v40, %v408_v38  ;;  %v1000_v38 = vld [vmem:[#allocation10] sm:$0xff] }
 0x513   :  { %752 = vmatpush.bf16.msra.mxu1 %v1000_v38 }
 0x579   :  { %v546_v41 = vpop.f32.mrf.mxu2 }
 0x57e   :  { %v477_v39 = vpop.f32.mrf.mxu1 }
 0x581   :  { %v548_v45 = vpop.f32.mrf.mxu2 }
 0x582   :  { %v1036_v46 = vpack.i.bf16 %v548_v45, %v546_v41 }
 0x586   :  { %v479_v42 = vpop.f32.mrf.mxu1 }
 0x587   :  { %v1026_v43 = vpack.i.bf16 %v479_v42, %v477_v39  ;;  %v1007_v39 = vld [vmem:[#allocation11 + $0x18] sm:$0xff] }
 0x588   :  { %803 = vmatpush.bf16.msrb.mxu3 %v1007_v39 }
 0x589   :  { %1027 = vrot.lane.b32.xlu1 %v1026_v43, %s1281_s1 }
 0x591   :  { %1032 = vrot.lane.b32.xlu1 %v1031_v44, %s1280_s20 }
 0x599   :  { %1037 = vrot.lane.b32.xlu1 %v1036_v46, %s1278_s7 }
 0x5fb   :  { %v1028_v51 = vpop.permute.xlu1 %1027 }
 0x5fc   :  { %v1030_v58 = vunpack.i.h.bf16 %v1028_v51  ;;  %v1029_v59 = vunpack.i.l.bf16 %v1028_v51 }
 0x603   :  { %v1033_v52 = vpop.permute.xlu1 %1032 }
 0x604   :  { %v1035_v53 = vunpack.i.h.bf16 %v1033_v52  ;;  %v1034_v54 = vunpack.i.l.bf16 %v1033_v52 }
 0x606   :  { %v576_v55 = vsel %vm279_vm2, %v1433_v23, %v1035_v53  ;;  %v575_v56 = vsel %vm279_vm2, %v1431_v22, %v1034_v54  ;;  %v1041_v23 = vld [vmem:[%s1532_s4] ss:$0 sm:$0xff] }
 0x607   :  { %v578_v63 = vsel %vm577_vm5, %v575_v56, %v1029_v59  ;;  %v579_v0 = vsel %vm577_vm5, %v576_v55, %v1030_v58  ;;  %v1042_v55 = vld [vmem:[%s1533_s5] ss:$0 sm:$0xff] }
 0x60b   :  { %v1038_v60 = vpop.permute.xlu1 %1037 }
 0x60c   :  { %v1040_v61 = vunpack.i.h.bf16 %v1038_v60  ;;  %v1039_v62 = vunpack.i.l.bf16 %v1038_v60  ;;  %v1043_v60 = vld [vmem:[%s1534_s6] ss:$0 sm:$0xff] }
 0x60e   :  { %v581_v1 = vsel %vm580_vm6, %v578_v63, %v1039_v62  ;;  %v582_v2 = vsel %vm580_vm6, %v579_v0, %v1040_v61 }
 0x60f   :  { %v583_v3 = vpack.c.bf16 %v582_v2, %v581_v1 }
 0x611   :  { %953 = vmatmul.msk.bf16.vlgmr.msra.gmra.mxu0 %vm620_vm7, %v583_v3  ;;  %v1006_v3 = vld [vmem:[#allocation11 + $0x10] sm:$0xff] }
 0x612   :  { %804 = vmatpush.bf16.msrb.mxu3 %v1006_v3 }
 0x68e   :  { %v633_v22 = vpop.f32.mrf.mxu0 }
 0x68f   :  { %v634_v4 = vadd.f32 %v1041_v23, %v633_v22  ;;  %v1004_v22 = vld [vmem:[#allocation11] sm:$0xff] }
 0x691   :  { %v638_v5 = vadd.f32 %v634_v4, %v1388_v21 }
 0x693   :  { %v642_v6 = vsel %vm193_vm1, %v638_v5, 0.0 }
 0x694   :  { %643 = vadd.xlane.f32.xlu0 %v642_v6 }
 0x696   :  { %v635_v57 = vpop.f32.mrf.mxu0 }
 0x697   :  { %v636_v7 = vadd.f32 %v1041_v23, %v635_v57  ;;  %v1005_v23 = vld [vmem:[#allocation11 + $0x8] sm:$0xff] }
 0x698   :  { %805 = vmatpush.bf16.msrb.mxu3 %v1005_v23 }
 0x699   :  { %v639_v8 = vadd.f32 %v636_v7, %v1390_v24 }
 0x69b   :  { %v645_v9 = vsel %vm193_vm1, %v639_v8, 0.0 }
 0x69c   :  { %646 = vadd.xlane.f32.xlu2 %v645_v9  ;;  %806 = vmatpush.bf16.msrb.mxu3 %v1004_v22  ;;  %v1045_v9 = vld [vmem:[%s1538_s10] ss:$0 sm:$0xff] }
 0x707   :  { %v644_v21 = vpop.xlane.xlu0 %643 }
 0x708   :  { %v655_v17 = vmul.f32 %v1483_v16, %v644_v21 }
 0x70a   :  { %v657_v18 = vsub.f32 %v638_v5, %v655_v17  ;;  %v1044_v5 = vld [vmem:[%s1536_s8] ss:$0 sm:$0xff] }
 0x70c   :  { %v659_v19 = vmul.f32 %v657_v18, %v657_v18 }
 0x70e   :  { %v661_v24 = vsel %vm193_vm1, %v659_v19, 0.0 }
 0x70f   :  { %v647_v20 = vpop.xlane.xlu2 %646  ;;  %662 = vadd.xlane.f32.xlu1 %v661_v24 }
 0x710   :  { %v656_v25 = vmul.f32 %v1483_v16, %v647_v20 }
 0x712   :  { %v658_v26 = vsub.f32 %v639_v8, %v656_v25 }
 0x714   :  { %v660_v27 = vmul.f32 %v658_v26, %v658_v26 }
 0x716   :  { %v664_v28 = vsel %vm193_vm1, %v660_v27, 0.0 }
 0x717   :  { %665 = vadd.xlane.f32.xlu0 %v664_v28 }
 0x782   :  { %v663_v35 = vpop.xlane.xlu1 %662 }
 0x783   :  { %v667_v36 = vmul.f32 %v663_v35, %v1483_v16 }
 0x785   :  { %v669_v37 = vadd.f32 1e-05, %v667_v36 }
 0x787   :  { %1082 = vrsqrt.f32 %v669_v37  ;;  %vm677_vm10 = vweird.f32 %v669_v37 }
 0x78a   :  { %v666_v40 = vpop.xlane.xlu0 %665 }
 0x78b   :  { %v668_v42 = vmul.f32 %v666_v40, %v1483_v16 }
 0x78d   :  { %v1083_v43 = vpop.eup %1082  ;;  %v670_v41 = vadd.f32 1e-05, %v668_v42 }
 0x78e   :  { %v672_v44 = vmul.f32 %v1083_v43, %v669_v37  ;;  %vm678_vm9 = vweird.f32 %v1083_v43 }
 0x78f   :  { %1084 = vrsqrt.f32 %v670_v41  ;;  %vm679_vm11 = vmor %vm677_vm10, %vm678_vm9  ;;  %vm687_vm13 = vweird.f32 %v670_v41 }
 0x790   :  { %v673_v45 = vmul.f32 %v1083_v43, %v672_v44 }
 0x792   :  { %v674_v46 = vmul.f32 0.5, %v673_v45  ;;  %v1046_v45 = vld [vmem:[%s1539_s11] ss:$0 sm:$0xff]  ;;  %s1285_s11 = smov [#allocation13]  }
 0x793   :  { %s877_s18 = sshll.u32 %s1285_s11, 4  ;;  %s878_s18 = int_to_ptr.vmem [resolvable:$true] %s877_s18 }
 0x794   :  { %v675_v47 = vsub.f32 1.5, %v674_v46 }
 0x795   :  { %v1085_v48 = vpop.eup %1084 }
 0x796   :  { %v676_v49 = vmul.f32 %v1083_v43, %v675_v47  ;;  %v682_v50 = vmul.f32 %v1085_v48, %v670_v41  ;;  %vm688_vm12 = vweird.f32 %v1085_v48 }
 0x797   :  { %vm689_vm14 = vmor %vm687_vm13, %vm688_vm12 }
 0x798   :  { %v683_v51 = vmul.f32 %v1085_v48, %v682_v50  ;;  %v680_v52 = vsel %vm679_vm11, %v1083_v43, %v676_v49 }
 0x799   :  { %v691_v56 = vmul.f32 %v680_v52, %v657_v18 }
 0x79a   :  { %v684_v53 = vmul.f32 0.5, %v683_v51 }
 0x79b   :  { %v696_v61 = vmul.f32 %v1042_v55, %v691_v56 }
 0x79c   :  { %v685_v54 = vsub.f32 1.5, %v684_v53 }
 0x79d   :  { %v701_v0 = vadd.f32 %v1043_v60, %v696_v61 }
 0x79e   :  { %v686_v58 = vmul.f32 %v1085_v48, %v685_v54 }
 0x7a0   :  { %v690_v59 = vsel %vm689_vm14, %v1085_v48, %v686_v58  ;;  %v1047_v48 = vld [vmem:[%s1540_s12] ss:$0 sm:$0xff] }
 0x7a1   :  { %v692_v62 = vmul.f32 %v690_v59, %v658_v26 }
 0x7a3   :  { %v697_v63 = vmul.f32 %v1042_v55, %v692_v62 }
 0x7a5   :  { %v702_v1 = vadd.f32 %v1043_v60, %v697_v63 }
 0x7a7   :  { %v703_v2 = vpack.c.bf16 %v702_v1, %v701_v0 }
 0x7a9   :  { %970 = vmatmul.msk.bf16.vlgmr.msra.gmra.mxu1 %vm193_vm1, %v703_v2 }
 0x826   :  { %v754_v4 = vpop.f32.mrf.mxu1 }
 0x827   :  { %v755_v57 = vadd.f32 %v1044_v5, %v754_v4 }
 0x82e   :  { %v756_v6 = vpop.f32.mrf.mxu1 }
 0x82f   :  { %v757_v7 = vadd.f32 %v1044_v5, %v756_v6 }
 0x831   :  { %v759_v8 = vpack.c.bf16 %v757_v7, %v755_v57 }
 0x833   :  { %987 = vmatmul.msk.bf16.vlgmr.msrb.gmra.mxu3 %vm620_vm7, %v759_v8 }
 0x8b6   :  { %v808_v10 = vpop.f32.mrf.mxu3 }
 0x8b7   :  { %v809_v11 = vadd.f32 %v1045_v9, %v808_v10 }
 0x8b9   :  { %v813_v12 = vadd.f32 %v809_v11, %v701_v0 }
 0x8bb   :  { %v817_v13 = vsel %vm193_vm1, %v813_v12, 0.0 }
 0x8bc   :  { %818 = vadd.xlane.f32.xlu2 %v817_v13 }
 0x8be   :  { %v810_v14 = vpop.f32.mrf.mxu3 }
 0x8bf   :  { %v811_v15 = vadd.f32 %v1045_v9, %v810_v14 }
 0x8c1   :  { %v814_v21 = vadd.f32 %v811_v15, %v702_v1 }
 0x8c3   :  { %v820_v17 = vsel %vm193_vm1, %v814_v21, 0.0 }
 0x8c4   :  { %821 = vadd.xlane.f32.xlu1 %v820_v17 }
 0x92f   :  { %v819_v18 = vpop.xlane.xlu2 %818 }
 0x930   :  { %v823_v19 = vmul.f32 %v819_v18, %v1483_v16 }
 0x932   :  { %v825_v24 = vsub.f32 %v813_v12, %v823_v19 }
 0x934   :  { %v827_v20 = vmul.f32 %v825_v24, %v825_v24 }
 0x936   :  { %v829_v25 = vsel %vm193_vm1, %v827_v20, 0.0 }
 0x937   :  { %v822_v26 = vpop.xlane.xlu1 %821  ;;  %830 = vadd.xlane.f32.xlu0 %v829_v25 }
 0x938   :  { %v824_v27 = vmul.f32 %v822_v26, %v1483_v16 }
 0x93a   :  { %v826_v28 = vsub.f32 %v814_v21, %v824_v27 }
 0x93c   :  { %v828_v29 = vmul.f32 %v826_v28, %v826_v28 }
 0x93e   :  { %v832_v30 = vsel %vm193_vm1, %v828_v29, 0.0 }
 0x93f   :  { %833 = vadd.xlane.f32.xlu2 %v832_v30 }
 0x9aa   :  { %v831_v31 = vpop.xlane.xlu0 %830 }
 0x9ab   :  { %v835_v32 = vmul.f32 %v831_v31, %v1483_v16 }
 0x9ad   :  { %v837_v33 = vadd.f32 1e-05, %v835_v32 }
 0x9af   :  { %1086 = vrsqrt.f32 %v837_v33  ;;  %vm845_vm0 = vweird.f32 %v837_v33 }
 0x9b2   :  { %v834_v34 = vpop.xlane.xlu2 %833 }
 0x9b3   :  { %v836_v35 = vmul.f32 %v834_v34, %v1483_v16 }
 0x9b5   :  { %v1087_v36 = vpop.eup %1086  ;;  %v838_v37 = vadd.f32 1e-05, %v836_v35 }
 0x9b6   :  { %v840_v38 = vmul.f32 %v1087_v36, %v837_v33  ;;  %vm846_vm15 = vweird.f32 %v1087_v36 }
 0x9b7   :  { %1088 = vrsqrt.f32 %v838_v37  ;;  %vm847_vm2 = vmor %vm845_vm0, %vm846_vm15  ;;  %vm855_vm4 = vweird.f32 %v838_v37 }
 0x9b8   :  { %v841_v39 = vmul.f32 %v1087_v36, %v840_v38 }
 0x9ba   :  { %v842_v40 = vmul.f32 0.5, %v841_v39 }
 0x9bc   :  { %v843_v42 = vsub.f32 1.5, %v842_v40 }
 0x9bd   :  { %v1089_v43 = vpop.eup %1088 }
 0x9be   :  { %v844_v41 = vmul.f32 %v1087_v36, %v843_v42  ;;  %v850_v44 = vmul.f32 %v1089_v43, %v838_v37  ;;  %vm856_vm3 = vweird.f32 %v1089_v43 }
 0x9bf   :  { %vm857_vm5 = vmor %vm855_vm4, %vm856_vm3 }
 0x9c0   :  { %v848_v46 = vsel %vm847_vm2, %v1087_v36, %v844_v41  ;;  %v851_v47 = vmul.f32 %v1089_v43, %v850_v44 }
 0x9c1   :  { %v859_v16 = vmul.f32 %v848_v46, %v825_v24 }
 0x9c2   :  { %v852_v49 = vmul.f32 0.5, %v851_v47 }
 0x9c3   :  { %v864_v50 = vmul.f32 %v1046_v45, %v859_v16 }
 0x9c4   :  { %v853_v51 = vsub.f32 1.5, %v852_v49 }
 0x9c5   :  { %v869_v52 = vadd.f32 %v1047_v48, %v864_v50 }
 0x9c6   :  { %v854_v53 = vmul.f32 %v1089_v43, %v853_v51 }
 0x9c7   :  { %871 = vst.msk [vmem:[#allocation13] sm:$0xff] %vm193_vm1, %v869_v52 }
 0x9c8   :  { %v858_v54 = vsel %vm857_vm5, %v1089_v43, %v854_v53 }
 0x9c9   :  { %v860_v55 = vmul.f32 %v858_v54, %v826_v28 }
 0x9cb   :  { %v865_v56 = vmul.f32 %v1046_v45, %v860_v55 }
 0x9cd   :  { %v870_v58 = vadd.f32 %v1047_v48, %v865_v56 }
 0x9cf   :  { %872 = vst.msk [vmem:[#allocation13 + $0x8] sm:$0xff] %vm193_vm1, %v870_v58 }
 0x9d0   :  { %885 = dma.vmem_to_hbm [thread:$0]  %s878_s18, 256, %s880_s2, [#allocation4], %s1269_s16, %s1269_s16, %s1270_s17  }
 0x9d1   :  { %1266 = dma.done.wait [#allocation4], 256  }
 0x9d2   :  { %1267 = vsyncadd [#allocation4], 4294967040 }
 0x9d3   :  { %890 = vsyncpa [#allocation3], 1 }
 0x9d4   :  { %891 = vsyncpa [#allocation6], 1 }
 0x9d5   :  { %892 = vsyncpa [#allocation9], 1 }
 0x9d6   :  { %893 = vsyncpa [#allocation12], 1 }
 0x9d7   :  { %894 = vsyncpa [#allocation4], 1 }

</bundles_post_ra>
